<compile_context>
chip_gen: v7x
topology: tpu7x:2x2x1
jax: 0.10.0
libtpu: 0.0.40
codegen_flags: <defaults>
</compile_context>

<pallas_src>
import jax
import jax.numpy as jnp
from jax.experimental import pallas as pl
from jax.experimental.pallas import tpu as pltpu

_SUBLANE = 8  # vreg sublane count: minimum batch-tile granularity


def _mlp_kernel(x_ref, w1_ref, b1_ref, w2_ref, b2_ref, w3_ref, b3_ref, o_ref):
    """One batch tile: Linear+ReLU -> (Flatten/Dropout = identity) ->
    Linear+Sigmoid -> Linear+Softmax. Weights/biases are VMEM-resident."""
    # Cast in-kernel (hidden under the input DMA) instead of rewriting x in HBM.
    x = x_ref[...].astype(w1_ref.dtype)

    # Linear(32, 32) + ReLU  (MXU, f32 accumulate)
    h1 = jnp.dot(x, w1_ref[...], preferred_element_type=jnp.float32) + b1_ref[...]
    h1 = jnp.maximum(h1, 0.0)

    # Flatten + Dropout(0.5): identity at inference time.
    # TODO(synk): training-mode dropout would need pltpu.prng_seed/prng_random_bits.

    # Linear(32, 16) + Sigmoid (elementwise math stays on the f32 accumulators)
    h2 = jnp.dot(h1.astype(w2_ref.dtype), w2_ref[...],
                 preferred_element_type=jnp.float32) + b2_ref[...]
    h2 = jax.nn.sigmoid(h2)

    # Linear(16, n_classes) + Softmax(dim=1); output kept n_classes wide.
    logits = jnp.dot(h2.astype(w3_ref.dtype), w3_ref[...],
                     preferred_element_type=jnp.float32) + b3_ref[...]
    m = jnp.max(logits, axis=-1, keepdims=True)
    e = jnp.exp(logits - m)
    denom = jnp.sum(e, axis=-1, keepdims=True)
    # Exact division (not pl.reciprocal(approx=True)): keeps sum-to-1 within
    # f32 rounding; this kernel has plenty of EUP/VPU slack.
    o_ref[...] = (e / denom).astype(o_ref.dtype)


def prepare_params(params, *, compute_dtype=jnp.float32):
    """One-time conversion (do NOT redo per forward call).

    Weights stored as [in, out] (= W.T) in compute_dtype; biases as f32 [1, out]
    rows.  bf16 operands are valid on v5e/v6e/v7x: the MXU accumulates in f32
    and all elementwise math in the kernel runs on those f32 accumulators."""
    (w1, b1), (w2, b2), (w3, b3) = params
    n_classes = w3.shape[1]
    prepped = (
        w1.astype(compute_dtype), b1.reshape(1, -1).astype(jnp.float32),
        w2.astype(compute_dtype), b2.reshape(1, -1).astype(jnp.float32),
        w3.astype(compute_dtype), b3.reshape(1, -1).astype(jnp.float32),
    )
    return prepped, n_classes


def neural_network_forward(x, prepped_params, n_classes, *, block_rows=None,
                           out_dtype=jnp.float32):
    """x: [batch, input_size] (f32 or bf16). Returns softmax probabilities
    [batch, n_classes] in out_dtype (f32 by default)."""
    w1, b1, w2, b2, w3, b3 = prepped_params
    batch, in_features = x.shape
    h1_dim, h2_dim = w1.shape[1], w2.shape[1]

    # Batch tile: big enough that each step moves >~0.5 MiB of x (amortizes the
    # ~0.35us/step grid overhead), capped at 4096 rows so double-buffered tiles
    # plus the f32 intermediates stay well inside v7x's 32 MiB scoped VMEM
    # default.  Keep >=2 grid steps once the batch is large enough so both v7x
    # TensorCores get work on the "parallel" axis.
    if block_rows is None:
        block_rows = min(4096, max(_SUBLANE, pl.next_power_of_2(batch)))
        if batch > 2 * _SUBLANE and pl.cdiv(batch, block_rows) < 2:
            block_rows = pl.cdiv(batch, 2)
    block_rows = max(_SUBLANE, pl.cdiv(block_rows, _SUBLANE) * _SUBLANE)
    grid_m = pl.cdiv(batch, block_rows)

    # No jnp.pad of x: the ragged final tile reads garbage rows past `batch`
    # (garbage-in/garbage-out per row) and Pallas drops out-of-bounds stores.

    param_bytes = sum(a.size * jnp.dtype(a.dtype).itemsize for a in prepped_params)
    cost = pl.CostEstimate(
        flops=2 * batch * (in_features * h1_dim + h1_dim * h2_dim
                           + h2_dim * n_classes),
        transcendentals=batch * (h2_dim + n_classes),
        bytes_accessed=x.size * jnp.dtype(x.dtype).itemsize
        + param_bytes
        + batch * n_classes * jnp.dtype(out_dtype).itemsize,
    )

    resident = lambda i: (0, 0)  # same block every step -> stays VMEM-resident

    out = pl.pallas_call(
        _mlp_kernel,
        out_shape=jax.ShapeDtypeStruct((batch, n_classes), out_dtype),
        grid=(grid_m,),
        in_specs=[
            pl.BlockSpec((block_rows, in_features), lambda i: (i, 0)),
            pl.BlockSpec(w1.shape, resident),
            pl.BlockSpec(b1.shape, resident),
            pl.BlockSpec(w2.shape, resident),
            pl.BlockSpec(b2.shape, resident),
            pl.BlockSpec(w3.shape, resident),
            pl.BlockSpec(b3.shape, resident),
        ],
        out_specs=pl.BlockSpec((block_rows, n_classes), lambda i: (i, 0)),
        compiler_params=pltpu.CompilerParams(
            dimension_semantics=("parallel",)),  # megacore sharding on v7x
        cost_estimate=cost,
    )(x, w1, b1, w2, b2, w3, b3)

    return out


def init_params(key, input_size, hidden_sizes, n_classes):
    """Deterministic PyTorch-Linear-style init; weights stored as [in, out] (= W.T)."""
    sizes = [input_size] + list(hidden_sizes) + [n_classes]
    params = []
    for i in range(len(sizes) - 1):
        key, kw, kb = jax.random.split(key, 3)
        fan_in, fan_out = sizes[i], sizes[i + 1]
        bound = 1.0 / (fan_in ** 0.5)
        w = jax.random.uniform(kw, (fan_in, fan_out), jnp.float32, -bound, bound)
        b = jax.random.uniform(kb, (fan_out,), jnp.float32, -bound, bound)
        params.append((w, b))
    return params


if __name__ == "__main__":
    embedding_size, max_sequence, n_classes = 8, 4, 4
    hidden_sizes = [32, 16]            # from ["relu32", "d0.5", "sigmoid16"]
    input_size = embedding_size * max_sequence   # 32
    batch = 2

    key = jax.random.PRNGKey(0)
    key, kx = jax.random.split(key)
    x = jax.random.normal(kx, (batch, input_size), dtype=jnp.float32)

    params = init_params(key, input_size, hidden_sizes, n_classes)

    # f32 path (closest to the f64 reference semantics)
    prepped_f32, nc = prepare_params(params, compute_dtype=jnp.float32)
    probs = jax.block_until_ready(neural_network_forward(x, prepped_f32, nc))

    # Pure-JAX reference (same f32 math)
    (w1, b1), (w2, b2), (w3, b3) = params
    r = jnp.maximum(x @ w1 + b1, 0.0)
    r = jax.nn.sigmoid(r @ w2 + b2)
    ref = jax.nn.softmax(r @ w3 + b3, axis=1)

    assert probs.shape == (batch, n_classes)
    assert jnp.allclose(jnp.sum(probs, axis=1), 1.0, atol=1e-5)
    assert jnp.allclose(probs, ref, atol=1e-4)

    # bf16 dot-operand path (bandwidth-bound variant; valid on v5e/v6e/v7x).
    prepped_bf16, _ = prepare_params(params, compute_dtype=jnp.bfloat16)
    probs_bf16 = jax.block_until_ready(neural_network_forward(x, prepped_bf16, nc))
    assert jnp.allclose(jnp.sum(probs_bf16, axis=1), 1.0, atol=1e-2)
    assert jnp.allclose(probs_bf16, ref, atol=5e-2)

    print("KERNEL_OK")
</pallas_src>

<mosaic_0001>
module attributes {stable_mosaic.version = 11 : i64} {
  func.func @_mlp_kernel(%arg0: i32, %arg1: memref<8x32xf32, #tpu.memory_space<vmem>>, %arg2: memref<32x32xf32, #tpu.memory_space<vmem>>, %arg3: memref<1x32xf32, #tpu.memory_space<vmem>>, %arg4: memref<32x16xf32, #tpu.memory_space<vmem>>, %arg5: memref<1x16xf32, #tpu.memory_space<vmem>>, %arg6: memref<16x4xf32, #tpu.memory_space<vmem>>, %arg7: memref<1x4xf32, #tpu.memory_space<vmem>>, %arg8: memref<8x4xf32, #tpu.memory_space<vmem>>) attributes {dimension_semantics = [#tpu.dimension_semantics<parallel>], iteration_bounds = array<i64: 1>, scalar_prefetch = 0 : i64, scratch_operands = 0 : i64, tpu.core_type = #tpu.core_type<tc>, window_params = [{transform_indices = @transform_0, window_bounds = array<i64: 8, 32>}, {pipeline_mode = #tpu.pipeline_mode<synchronous>, transform_indices = @transform_1, window_bounds = array<i64: 32, 32>}, {pipeline_mode = #tpu.pipeline_mode<synchronous>, transform_indices = @transform_2, window_bounds = array<i64: 1, 32>}, {pipeline_mode = #tpu.pipeline_mode<synchronous>, transform_indices = @transform_3, window_bounds = array<i64: 32, 16>}, {pipeline_mode = #tpu.pipeline_mode<synchronous>, transform_indices = @transform_4, window_bounds = array<i64: 1, 16>}, {pipeline_mode = #tpu.pipeline_mode<synchronous>, transform_indices = @transform_5, window_bounds = array<i64: 16, 4>}, {pipeline_mode = #tpu.pipeline_mode<synchronous>, transform_indices = @transform_6, window_bounds = array<i64: 1, 4>}, {transform_indices = @transform_7, window_bounds = array<i64: 8, 4>}]} {
    %c0 = arith.constant 0 : index
    %c0_0 = arith.constant 0 : index
    %0 = vector.load %arg1[%c0, %c0_0] : memref<8x32xf32, #tpu.memory_space<vmem>>, vector<8x32xf32>
    %c0_1 = arith.constant 0 : index
    %c0_2 = arith.constant 0 : index
    %1 = vector.load %arg2[%c0_1, %c0_2] : memref<32x32xf32, #tpu.memory_space<vmem>>, vector<32x32xf32>
    %cst = arith.constant dense<0.000000e+00> : vector<8x32xf32>
    %2 = tpu.matmul %0, %1, %cst {dimension_numbers = #tpu.dot_dimension_numbers<[1], [0], [0], [1], [0, 0, 1, 1], [], []>} : vector<8x32xf32>, vector<32x32xf32>, vector<8x32xf32> -> vector<8x32xf32>
    %c0_3 = arith.constant 0 : index
    %c0_4 = arith.constant 0 : index
    %3 = vector.load %arg3[%c0_3, %c0_4] : memref<1x32xf32, #tpu.memory_space<vmem>>, vector<1x32xf32>
    %4 = vector.broadcast %3 : vector<1x32xf32> to vector<8x32xf32>
    %5 = arith.addf %2, %4 : vector<8x32xf32>
    %cst_5 = arith.constant 0.000000e+00 : f32
    %6 = vector.broadcast %cst_5 : f32 to vector<8x32xf32>
    %7 = arith.maximumf %5, %6 : vector<8x32xf32>
    %c0_6 = arith.constant 0 : index
    %c0_7 = arith.constant 0 : index
    %8 = vector.load %arg4[%c0_6, %c0_7] : memref<32x16xf32, #tpu.memory_space<vmem>>, vector<32x16xf32>
    %cst_8 = arith.constant dense<0.000000e+00> : vector<8x16xf32>
    %9 = tpu.matmul %7, %8, %cst_8 {dimension_numbers = #tpu.dot_dimension_numbers<[1], [0], [0], [1], [0, 0, 1, 1], [], []>} : vector<8x32xf32>, vector<32x16xf32>, vector<8x16xf32> -> vector<8x16xf32>
    %c0_9 = arith.constant 0 : index
    %c0_10 = arith.constant 0 : index
    %10 = vector.load %arg5[%c0_9, %c0_10] : memref<1x16xf32, #tpu.memory_space<vmem>>, vector<1x16xf32>
    %11 = vector.broadcast %10 : vector<1x16xf32> to vector<8x16xf32>
    %12 = arith.addf %9, %11 : vector<8x16xf32>
    %13 = arith.negf %12 : vector<8x16xf32>
    %14 = math.exp %13 : vector<8x16xf32>
    %cst_11 = arith.constant 1.000000e+00 : f32
    %15 = vector.broadcast %cst_11 : f32 to vector<8x16xf32>
    %16 = arith.addf %15, %14 : vector<8x16xf32>
    %17 = arith.divf %15, %16 : vector<8x16xf32>
    %c0_12 = arith.constant 0 : index
    %c0_13 = arith.constant 0 : index
    %18 = vector.load %arg6[%c0_12, %c0_13] : memref<16x4xf32, #tpu.memory_space<vmem>>, vector<16x4xf32>
    %cst_14 = arith.constant dense<0.000000e+00> : vector<8x4xf32>
    %19 = tpu.matmul %17, %18, %cst_14 {dimension_numbers = #tpu.dot_dimension_numbers<[1], [0], [0], [1], [0, 0, 1, 1], [], []>} : vector<8x16xf32>, vector<16x4xf32>, vector<8x4xf32> -> vector<8x4xf32>
    %c0_15 = arith.constant 0 : index
    %c0_16 = arith.constant 0 : index
    %20 = vector.load %arg7[%c0_15, %c0_16] : memref<1x4xf32, #tpu.memory_space<vmem>>, vector<1x4xf32>
    %21 = vector.broadcast %20 : vector<1x4xf32> to vector<8x4xf32>
    %22 = arith.addf %19, %21 : vector<8x4xf32>
    %cst_17 = arith.constant dense<0xFF800000> : vector<8xf32>
    %23 = vector.multi_reduction <maximumf>, %22, %cst_17 [1] : vector<8x4xf32> to vector<8xf32>
    %24 = vector.shape_cast %23 : vector<8xf32> to vector<8x1xf32>
    %25 = vector.broadcast %24 : vector<8x1xf32> to vector<8x4xf32>
    %26 = arith.subf %22, %25 : vector<8x4xf32>
    %27 = math.exp %26 : vector<8x4xf32>
    %cst_18 = arith.constant dense<0.000000e+00> : vector<8xf32>
    %28 = vector.multi_reduction <add>, %27, %cst_18 [1] : vector<8x4xf32> to vector<8xf32>
    %29 = vector.shape_cast %28 : vector<8xf32> to vector<8x1xf32>
    %30 = vector.broadcast %29 : vector<8x1xf32> to vector<8x4xf32>
    %31 = arith.divf %27, %30 : vector<8x4xf32>
    %c0_19 = arith.constant 0 : index
    %c0_20 = arith.constant 0 : index
    %32 = vector.load %arg8[%c0_19, %c0_20] : memref<8x4xf32, #tpu.memory_space<vmem>>, vector<8x4xf32>
    tpu.vector_store %arg8[%c0_19, %c0_20], %31 {strides = array<i32>} : memref<8x4xf32, #tpu.memory_space<vmem>>, vector<8x4xf32>,
    return
  }
  func.func @transform_0(%arg0: i32) -> (i32, i32) {
    %c0_i32 = arith.constant 0 : i32
    %c0_i32_0 = arith.constant 0 : i32
    return %arg0, %c0_i32 : i32, i32
  }
  func.func @transform_1(%arg0: i32) -> (i32, i32) {
    %c0_i32 = arith.constant 0 : i32
    %c0_i32_0 = arith.constant 0 : i32
    %c0_i32_1 = arith.constant 0 : i32
    return %c0_i32, %c0_i32_0 : i32, i32
  }
  func.func @transform_2(%arg0: i32) -> (i32, i32) {
    %c0_i32 = arith.constant 0 : i32
    %c0_i32_0 = arith.constant 0 : i32
    %c0_i32_1 = arith.constant 0 : i32
    return %c0_i32, %c0_i32_0 : i32, i32
  }
  func.func @transform_3(%arg0: i32) -> (i32, i32) {
    %c0_i32 = arith.constant 0 : i32
    %c0_i32_0 = arith.constant 0 : i32
    %c0_i32_1 = arith.constant 0 : i32
    return %c0_i32, %c0_i32_0 : i32, i32
  }
  func.func @transform_4(%arg0: i32) -> (i32, i32) {
    %c0_i32 = arith.constant 0 : i32
    %c0_i32_0 = arith.constant 0 : i32
    %c0_i32_1 = arith.constant 0 : i32
    return %c0_i32, %c0_i32_0 : i32, i32
  }
  func.func @transform_5(%arg0: i32) -> (i32, i32) {
    %c0_i32 = arith.constant 0 : i32
    %c0_i32_0 = arith.constant 0 : i32
    %c0_i32_1 = arith.constant 0 : i32
    return %c0_i32, %c0_i32_0 : i32, i32
  }
  func.func @transform_6(%arg0: i32) -> (i32, i32) {
    %c0_i32 = arith.constant 0 : i32
    %c0_i32_0 = arith.constant 0 : i32
    %c0_i32_1 = arith.constant 0 : i32
    return %c0_i32, %c0_i32_0 : i32, i32
  }
  func.func @transform_7(%arg0: i32) -> (i32, i32) {
    %c0_i32 = arith.constant 0 : i32
    %c0_i32_0 = arith.constant 0 : i32
    return %arg0, %c0_i32 : i32, i32
  }
}

</mosaic_0001>

<bundles_post_ra>
// kernel: tpu_custom_call.1
= control target key start
LH: loop header
LB: loop body
LE: loop exit
PB: predicated region body
PF: predicated region fallthrough
CT: control target
= control target key end

     0   :  { %12 = vsyncpa [#allocation3], 0  ;;  %v418_v2 = vmov 0.0|0.0   ;;  %vm419_vm0 = vmmov 0   ;;  %v420_v6 = vmov 0.0   ;;  %vm39_vm1 = vcmask 261120   ;;  %s524_s0 = inlined_call_operand.vmem [shape: f32[2,32], index: 0, kind: input, shape index: {}]   ;;  %s525_s1 = inlined_call_operand.vmem [shape: f32[32,32], index: 1, kind: input, shape index: {}]   ;;  %s526_s2 = inlined_call_operand.vmem [shape: f32[1,32], index: 2, kind: input, shape index: {}]   ;;  %s527_s3 = inlined_call_operand.vmem [shape: f32[32,16], index: 3, kind: input, shape index: {}]   ;;  %s528_s4 = inlined_call_operand.vmem [shape: f32[1,16], index: 4, kind: input, shape index: {}]   ;;  %s529_s5 = inlined_call_operand.vmem [shape: f32[16,4], index: 5, kind: input, shape index: {}]   ;;  %s530_s6 = inlined_call_operand.vmem [shape: f32[1,4], index: 6, kind: input, shape index: {}]   ;;  %s531_s7 = inlined_call_operand.hbm [shape: f32[2,4], index: 7, kind: output, shape index: {}]  }
   0x1   :  { %v28_v0 = vld [vmem:[%s525_s1] sm:$0xff]  ;;  %v29_v1 = vld [vmem:[%s525_s1 + $0x8] sm:$0xff]  ;;  %365 = vmatprep.subr.bf16.mxu0 %v418_v2  ;;  %v30_v4 = vld [vmem:[%s525_s1 + $0x10] sm:$0xff]  ;;  %371 = vmatprep.subr.bf16.mxu1 %v418_v2  ;;  %vm213_vm2 = vcmask 130048   ;;  %vm287_vm3 = vcmask 31744  }
   0x2   :  { %v366_v3 = vpack.c.bf16 %v29_v1, %v28_v0  ;;  %v31_v5 = vld [vmem:[%s525_s1 + $0x18] sm:$0xff]  ;;  %344 = vmatprep.mubr.msk.f32.mxu0 %vm419_vm0, %v420_v6  ;;  %v114_v7 = vld [vmem:[%s527_s3] sm:$0xff]  ;;  %v115_v8 = vld [vmem:[%s527_s3 + $0x8] sm:$0xff]  ;;  %355 = vmatprep.mubr.msk.f32.mxu1 %vm419_vm0, %v420_v6 }
   0x3   :  { %v369_v9 = vpack.c.bf16 %v31_v5, %v30_v4  ;;  %v372_v10 = vpack.c.bf16 %v115_v8, %v114_v7  ;;  %v27_v11 = vld [vmem:[%s524_s0] sm:$0xff]  ;;  %v116_v12 = vld [vmem:[%s527_s3 + $0x10] sm:$0xff]  ;;  %v117_v13 = vld [vmem:[%s527_s3 + $0x18] sm:$0xff] }
   0x4   :  { %367 = vmatpush3.bf16.msra.mxu0 %v366_v3  ;;  %v375_v14 = vpack.c.bf16 %v117_v13, %v116_v12  ;;  %v316_v15 = vld [vmem:[%s526_s2] ss:$0 sm:$0xff]  ;;  %v205_v21 = vld [vmem:[%s529_s5 + $0x8] sm:$0xff] }
   0x5   :  { %368 = vmatprep.subr.bf16.mxu0 %v418_v2  ;;  %373 = vmatpush3.bf16.msra.mxu1 %v372_v10  ;;  %v204_v20 = vld [vmem:[%s529_s5] sm:$0xff] }
   0x6   :  { %374 = vmatprep.subr.bf16.mxu1 %v418_v2  ;;  %v378_v22 = vpack.c.bf16 %v205_v21, %v204_v20  ;;  %v318_v23 = vld [vmem:[%s528_s4] ss:$0 sm:$0xff] }
   0x7   :  { %v321_v31 = vld [vmem:[%s530_s6] ss:$0 sm:$0xff] }
   0x8   :  { %370 = vmatpush3.bf16.msra.mxu0 %v369_v9 }
   0x9   :  { %377 = vmatprep.subr.bf16.mxu0 %v418_v2  ;;  %376 = vmatpush3.bf16.msra.mxu1 %v375_v14 }
   0xb   :  { %345 = vmatmul.mubr.msk.f32.vlgmr.msra.gmra.mrb[0].mxu0 %vm39_vm1, %v27_v11 }
   0xc   :  { %362 = vmatprep.mubr.msk.f32.mxu0 %vm419_vm0, %v420_v6  ;;  %379 = vmatpush3.bf16.msra.mxu0 %v378_v22 }
  0xde   :  { %v109_v16 = vpop.f32.mrb[0].mxu0 }
  0xdf   :  { %v110_v17 = vadd.f32 %v316_v15, %v109_v16  ;;  %v346_v18 = vpop.f32.mrb[1].mxu0 }
  0xe1   :  { %v113_v19 = vmax.f32 %v110_v17, 0.0 }
  0xe3   :  { %356 = vmatmul.mubr.msk.f32.vlgmr.msra.gmra.mrb[0].mxu1 %vm39_vm1, %v113_v19 }
 0x1b6   :  { %v194_v24 = vpop.f32.mrb[0].mxu1 }
 0x1b7   :  { %v195_v25 = vadd.f32 %v318_v23, %v194_v24  ;;  %v357_v26 = vpop.f32.mrb[1].mxu1 }
 0x1b9   :  { %v320_v27 = vmul.f32 -1.442695, %v195_v25 }
 0x1bb   :  { %386 = vpow2.f32 %v320_v27 }
 0x1c5   :  { %v387_v28 = vpop.eup %386 }
 0x1c6   :  { %v201_v29 = vadd.f32 1.0, %v387_v28 }
 0x1c8   :  { %388 = vrcp.f32 %v201_v29 }
 0x1d2   :  { %v389_v30 = vpop.eup %388 }
 0x1d3   :  { %363 = vmatmul.mubr.msk.f32.vlgmr.msra.gmra.mrb[2].mxu0 %vm213_vm2, %v389_v30 }
 0x2a6   :  { %v283_v32 = vpop.f32.mrb[2].mxu0 }
 0x2a7   :  { %v284_v33 = vadd.f32 %v321_v31, %v283_v32  ;;  %v364_v34 = vpop.f32.mrb[3].mxu0 }
 0x2a9   :  { %v288_v35 = vsel %vm287_vm3, %v284_v33, -inf }
 0x2aa   :  { %289 = vmax.xlane.f32.xlu0 %v288_v35 }
 0x337   :  { %v290_v36 = vpop.xlane.xlu0 %289 }
 0x338   :  { %v291_v37 = vsub.f32 %v284_v33, %v290_v36 }
 0x33a   :  { %v292_v38 = vmul.f32 1.442695, %v291_v37 }
 0x33c   :  { %390 = vpow2.f32 %v292_v38 }
 0x346   :  { %v391_v39 = vpop.eup %390 }
 0x347   :  { %v294_v40 = vsel %vm287_vm3, %v391_v39, 0.0 }
 0x348   :  { %295 = vadd.xlane.f32.xlu0 %v294_v40 }
 0x3d5   :  { %v296_v41 = vpop.xlane.xlu0 %295 }
 0x3d6   :  { %392 = vrcp.f32 %v296_v41 }
 0x3e0   :  { %v393_v42 = vpop.eup %392 }
 0x3e1   :  { %v298_v43 = vmul.f32 %v393_v42, %v391_v39 }
 0x3e3   :  { %299 = vst.msk [vmem:[#allocation2] sm:$0xff] %vm287_vm3, %v298_v43 }
 0x3e4   :  { %304 = vsyncadd [#allocation3], 96  ;;  %s421_s4 = smov [#allocation2]  }
 0x3e5   :  { %s305_s5 = sshll.u32 %s421_s4, 4  ;;  %s306_s5 = int_to_ptr.vmem [resolvable:$true] %s305_s5 }
 0x3e6   :  { %s394_s6 = scalar_lea.vmem %s306_s5, 32  ;;  %s398_s25 = scalar_lea.vmem %s306_s5, 128 }
 0x3e7   :  { %p395_p0 = scmp.ne.s32.totalorder %s306_s5, %s394_s6  ;;  %p399_p1 = scmp.lt.s32.totalorder %s306_s5, %s306_s5 }
 0x3e8   :  { %p400_p2 = scmp.lt.s32.totalorder %s398_s25, %s394_s6 }
 0x3ea   :  { %p401_p3 = por %p400_p2, %p399_p1 }
 0x3ec   :  { %p402_p4 = pnand %p401_p3, %p395_p0 }
 0x3ee   :  { %405 = shalt.err (!%p402_p4)
}
 0x3ef   :  { %s406_s28 = scalar_lea.hbm %s531_s7, 32 }
 0x3f0   :  { %p407_p5 = scmp.ne.s32.totalorder %s531_s7, %s406_s28  ;;  %p410_p6 = scmp.lt.u32.totalorder %s406_s28, %s531_s7 }
 0x3f2   :  { %p412_p7 = pnand %p410_p6, %p407_p5 }
 0x3f4   :  { %415 = shalt.err (!%p412_p7)
}
 0x3f5   :  { %s422_s10 = smov 32   ;;  %s423_s11 = smov 2  }
 0x3f6   :  { %311 = dma.vmem_to_hbm [thread:$0]  %s306_s5, 32, %s531_s7, [#allocation3], %s422_s10, %s422_s10, %s423_s11  }
 0x3f7   :  { %416 = dma.done.wait [#allocation3], 128  }
 0x3f8   :  { %417 = vsyncadd [#allocation3], 4294967168 }
 0x3f9   :  { %315 = vsyncpa [#allocation3], 1 }

</bundles_post_ra>
